<compile_context>
chip_gen: v7x
topology: tpu7x:2x2x1
jax: 0.10.0
libtpu: 0.0.40
codegen_flags: <defaults>
</compile_context>

<pallas_src>
import functools

import jax
import jax.numpy as jnp
from jax.experimental import pallas as pl
from jax.experimental.pallas import tpu as pltpu


# --------------------------------------------------------------------------- #
# shared kernel helpers (traced inside the kernels)
# --------------------------------------------------------------------------- #

def _embedding_mlp(obs_nb, self_rep_f32, we1n, be1, we2, be2):
    """embedding_mlp: Linear -> tanh -> Linear -> tanh on (rows, .) operands."""
    f32, bf16 = jnp.float32, jnp.bfloat16
    h1 = jnp.tanh(jnp.dot(obs_nb, we1n, preferred_element_type=f32)
                  + self_rep_f32 + be1)
    return jnp.tanh(jnp.dot(h1.astype(bf16), we2, preferred_element_type=f32)
                    + be2)


def _values_attention(emb, mean_rep_f32, wva, b1cat, w2bd, b2cat,
                      wa3pad, ba3, n):
    """value MLP + attention MLP (fused), softmax, weighted neighbor sum."""
    f32, bf16 = jnp.float32, jnp.bfloat16
    rows, h = emb.shape

    # value fc1 and attention fc1 (embedding half) in one MXU pass
    fused = jnp.dot(emb.astype(bf16), wva, preferred_element_type=f32)  # (rows, 2H)
    addend = jnp.concatenate([jnp.zeros_like(mean_rep_f32), mean_rep_f32], axis=1)
    va1 = jnp.tanh(fused + addend + b1cat)

    # value fc2 and attention fc2 fused block-diagonally: one (2H, 2H) pass
    va2 = jnp.tanh(jnp.dot(va1.astype(bf16), w2bd, preferred_element_type=f32)
                   + b2cat)                                             # (rows, 2H)

    # attention head (H -> 1): VPU multiply + lane reduction (wa3pad is zero
    # over the value half, so no mid-vreg lane slice is needed here)
    logits = jnp.sum(va2 * wa3pad, axis=-1, keepdims=True) + ba3        # (rows, 1)
    logits = logits.reshape(rows // n, n)                               # per-batch groups
    mx = jnp.max(logits, axis=-1, keepdims=True)
    p = jnp.exp(logits - mx)
    attn = p / jnp.sum(p, axis=-1, keepdims=True)                       # exact softmax

    weighted = va2[:, :h] * attn.reshape(rows, 1)                       # (rows, H)
    return jnp.sum(weighted.reshape(rows // n, n, h), axis=1)           # (rows//N, H)


# --------------------------------------------------------------------------- #
# kernels
# --------------------------------------------------------------------------- #

def _fused_kernel(self_obs_ref, obs_nb_ref,
                  we1s_ref, we1n_ref, be1_ref, we2_ref, be2_ref,
                  wa1m_ref, wva_ref, b1cat_ref, w2bd_ref, b2cat_ref,
                  wa3pad_ref, ba3_ref, out_ref, *, n):
    """Whole forward in a single kernel: no intermediate ever leaves VMEM."""
    f32, bf16 = jnp.float32, jnp.bfloat16
    b, h = out_ref.shape

    # hoisted self projection (1/N of the rows torch pushes through this layer)
    self_proj = jnp.dot(self_obs_ref[...], we1s_ref[...],
                        preferred_element_type=f32)                     # (B, H)
    # torch `self_obs.repeat(N, 1)`: global row r uses index r % B, which is
    # exactly N stacked copies of the compact projection.
    self_rep = jnp.concatenate([self_proj] * n, axis=0)                 # (B*N, H)

    emb = _embedding_mlp(obs_nb_ref[...], self_rep, we1n_ref[...],
                         be1_ref[...], we2_ref[...], be2_ref[...])      # (rows, H)

    # per-batch mean (group = r // N) folded with the attention-fc1 mean half
    mean = jnp.mean(emb.reshape(b, n, h), axis=1)                       # (B, H)
    mean_proj = jnp.dot(mean.astype(bf16), wa1m_ref[...],
                        preferred_element_type=f32)                     # (B, H)
    mean_rep = jnp.concatenate([mean_proj] * n, axis=0)                 # (rows, H)

    out_ref[...] = _values_attention(emb, mean_rep, wva_ref[...],
                                     b1cat_ref[...], w2bd_ref[...],
                                     b2cat_ref[...], wa3pad_ref[...],
                                     ba3_ref[...], n)


def _phase1_kernel(self_rep_ref, obs_nb_ref,
                   we1n_ref, be1_ref, we2_ref, be2_ref, wa1m_ref,
                   meanp_ref, *, n):
    """Tiled phase 1: embedding MLP + per-batch mean, projected by Wa1[H:]."""
    f32, bf16 = jnp.float32, jnp.bfloat16
    tb, h = meanp_ref.shape
    emb = _embedding_mlp(obs_nb_ref[...], self_rep_ref[...].astype(f32),
                         we1n_ref[...], be1_ref[...], we2_ref[...], be2_ref[...])
    mean = jnp.mean(emb.reshape(tb, n, h), axis=1)
    meanp_ref[...] = jnp.dot(mean.astype(bf16), wa1m_ref[...],
                             preferred_element_type=f32)


def _phase2_kernel(self_rep_ref, mean_rep_ref, obs_nb_ref,
                   we1n_ref, be1_ref, we2_ref, be2_ref,
                   wva_ref, b1cat_ref, w2bd_ref, b2cat_ref,
                   wa3pad_ref, ba3_ref, out_ref, *, n):
    """Tiled phase 2: recompute the cheap embedding MLP (no emb spill), then
    value/attention MLPs + softmax + weighted neighbor sum."""
    emb = _embedding_mlp(obs_nb_ref[...], self_rep_ref[...].astype(jnp.float32),
                         we1n_ref[...], be1_ref[...], we2_ref[...], be2_ref[...])
    out_ref[...] = _values_attention(emb, mean_rep_ref[...], wva_ref[...],
                                     b1cat_ref[...], w2bd_ref[...],
                                     b2cat_ref[...], wa3pad_ref[...],
                                     ba3_ref[...], n)


# --------------------------------------------------------------------------- #
# wrapper
# --------------------------------------------------------------------------- #

def _divisors(x):
    out = set()
    d = 1
    while d * d <= x:
        if x % d == 0:
            out.add(d)
            out.add(x // d)
        d += 1
    return sorted(out)


def _pick_num_tiles(batch, n, row_cap):
    """Number of grid steps m for the tiled path.

    Constraints (so the torch `.repeat` i%B pairing reduces to a modular
    BlockSpec index map and all blocks are (8,128)-clean):
      * m | B                     (per-batch output tiles divide evenly)
      * N | m  =>  t_rows | B     (the self/mean rows one tile needs are one
                                   contiguous aligned block of the compact
                                   (B, H) projections)
      * tb = B/m is a multiple of 8
    Prefers the largest tile (smallest m) whose row count fits the budget.
    """
    cands = [m for m in _divisors(batch)
             if m >= 2 and m % n == 0 and (batch // m) % 8 == 0]
    if not cands:
        return None
    for m in cands:                       # ascending m  ==  descending tile size
        if (batch // m) * n <= row_cap:
            return m
    return cands[-1]                      # smallest tile always fits VMEM


def quad_neighborhood_encoder_attention(
        self_obs, obs, params, *,
        self_obs_dim, neighbor_obs_dim, neighbor_hidden_size,
        num_use_neighbor_obs, batch_size,
        force_path=None, max_tile_rows=None):
    S, Dn, H, N, B = (self_obs_dim, neighbor_obs_dim, neighbor_hidden_size,
                      num_use_neighbor_obs, batch_size)
    f32, bf16 = jnp.float32, jnp.bfloat16
    rows = B * N

    # ---- generation-aware VMEM budget (v7x: 64 MiB phys, v5e/v6e: 128 MiB) ----
    try:
        vmem_cap = int(pltpu.get_tpu_info().vmem_capacity_bytes)
    except Exception:
        vmem_cap = 64 * 1024 * 1024        # conservative (v7x-sized) default
    vmem_limit = int(min(vmem_cap * 3 // 4, 100 * 1024 * 1024))

    # ---- weight packing (tiny, traced once) ----
    we1, wa1 = params["we1"], params["wa1"]
    we1s = we1[:S].astype(bf16)            # self half of embedding fc1
    we1n = we1[S:].astype(bf16)            # neighbor half of embedding fc1
    be1 = params["be1"].astype(f32)
    we2 = params["we2"].astype(bf16)
    be2 = params["be2"].astype(f32)
    wa1m = wa1[H:].astype(bf16)            # mean half of attention fc1
    # value fc1 and attention fc1 (embedding half) share one MXU pass
    wva = jnp.concatenate([params["wv1"], wa1[:H]], axis=1).astype(bf16)     # (H, 2H)
    b1cat = jnp.concatenate([params["bv1"], params["ba1"]], axis=1).astype(f32)
    # value fc2 and attention fc2 fused block-diagonally into one (2H, 2H) pass
    zh = jnp.zeros((H, H), f32)
    w2bd = jnp.concatenate(
        [jnp.concatenate([params["wv2"], zh], axis=1),
         jnp.concatenate([zh, params["wa2"]], axis=1)], axis=0).astype(bf16)  # (2H, 2H)
    b2cat = jnp.concatenate([params["bv2"], params["ba2"]], axis=1).astype(f32)
    wa3pad = jnp.concatenate([jnp.zeros((1, H), f32),
                              params["wa3"].reshape(1, H).astype(f32)], axis=1)
    ba3 = params["ba3"].reshape(1, 1).astype(f32)

    # ---- inputs: NO (rows, H) replicated streams are materialized in HBM ----
    obs_nb = obs[:, S:S + Dn * N].reshape(rows, Dn).astype(bf16)
    self_obs_bf = self_obs.astype(bf16)

    # ---- path selection ----
    per_row_bytes = 44 * H + 8 * Dn        # rough live-intermediate bytes / row
    fused_fits = rows * per_row_bytes + (1 << 20) <= vmem_limit // 2
    row_cap = max(8 * N, (vmem_limit // 3) // per_row_bytes)
    if max_tile_rows is not None:
        row_cap = min(row_cap, max_tile_rows)
    m = _pick_num_tiles(B, N, row_cap)

    path = force_path
    if path is None:
        path = "fused" if (fused_fits or m is None) else "tiled"
    if path == "tiled" and m is None:
        # TODO(synk): batch sizes that admit no (m | B, N | m) tiling need a
        # dynamic in-kernel i%B replication (pltpu.roll with dynamic shift);
        # fall back to the single-tile fused kernel for now.
        path = "fused"

    # ---------------- fused single-kernel path (typical B) ------------------ #
    if path == "fused":
        return pl.pallas_call(
            functools.partial(_fused_kernel, n=N),
            out_shape=jax.ShapeDtypeStruct((B, H), f32),
            compiler_params=pltpu.CompilerParams(vmem_limit_bytes=vmem_limit),
        )(self_obs_bf, obs_nb, we1s, we1n, be1, we2, be2, wa1m,
          wva, b1cat, w2bd, b2cat, wa3pad, ba3)

    # ---------------- tiled two-phase path (large B) ------------------------ #
    tb = B // m                            # batches per grid step
    t_rows = tb * N                        # rows per grid step  (t_rows | B)
    nb = B // t_rows                       # compact-projection blocks in B

    # hoisted self projection kept compact: (B, H), never replicated in HBM
    self_proj = jnp.dot(self_obs_bf, we1s, preferred_element_type=f32).astype(bf16)

    cparams = pltpu.CompilerParams(dimension_semantics=("parallel",),
                                   vmem_limit_bytes=vmem_limit)

    def full(arr):                         # VMEM-resident weight / bias
        nd = arr.ndim
        return pl.BlockSpec(arr.shape, lambda i: (0,) * nd)

    # global row r needs proj[r % B]; with t_rows | B that is exactly the
    # (i % nb)-th t_rows-row block of the compact (B, H) projection.
    rep_spec = pl.BlockSpec((t_rows, H), lambda i: (i % nb, 0))
    obs_spec = pl.BlockSpec((t_rows, Dn), lambda i: (i, 0))
    per_batch_spec = pl.BlockSpec((tb, H), lambda i: (i, 0))

    mean_proj = pl.pallas_call(
        functools.partial(_phase1_kernel, n=N),
        grid=(m,),
        in_specs=[rep_spec, obs_spec,
                  full(we1n), full(be1), full(we2), full(be2), full(wa1m)],
        out_specs=per_batch_spec,
        out_shape=jax.ShapeDtypeStruct((B, H), f32),
        compiler_params=cparams,
    )(self_proj, obs_nb, we1n, be1, we2, be2, wa1m)

    return pl.pallas_call(
        functools.partial(_phase2_kernel, n=N),
        grid=(m,),
        in_specs=[rep_spec, rep_spec, obs_spec,
                  full(we1n), full(be1), full(we2), full(be2),
                  full(wva), full(b1cat), full(w2bd), full(b2cat),
                  full(wa3pad), full(ba3)],
        out_specs=per_batch_spec,
        out_shape=jax.ShapeDtypeStruct((B, H), f32),
        compiler_params=cparams,
    )(self_proj, mean_proj, obs_nb, we1n, be1, we2, be2,
      wva, b1cat, w2bd, b2cat, wa3pad, ba3)


# --------------------------------------------------------------------------- #
# reference / test
# --------------------------------------------------------------------------- #

def _reference(self_obs, obs, params, *, S, Dn, H, N, B):
    """Pure-JAX f32 transcription of the PyTorch forward."""
    all_n = Dn * N
    obs_nb = obs[:, S:S + all_n].reshape(-1, Dn)
    self_rep = jnp.tile(self_obs, (N, 1))
    x = jnp.concatenate([self_rep, obs_nb], axis=1)
    emb = jnp.tanh(jnp.tanh(x @ params["we1"] + params["be1"]) @ params["we2"]
                   + params["be2"])
    vals = jnp.tanh(jnp.tanh(emb @ params["wv1"] + params["bv1"]) @ params["wv2"]
                    + params["bv2"])
    mean = jnp.mean(emb.reshape(B, -1, H), axis=1)
    mean_rep = jnp.tile(mean, (N, 1))
    a_in = jnp.concatenate([emb, mean_rep], axis=1)
    a = jnp.tanh(a_in @ params["wa1"] + params["ba1"])
    a = jnp.tanh(a @ params["wa2"] + params["ba2"])
    logits = (a @ params["wa3"] + params["ba3"]).reshape(B, -1)
    w = jax.nn.softmax(logits, axis=1).reshape(-1, 1)
    return jnp.sum((w * vals).reshape(B, -1, H), axis=1)


def _init_params(key, S, Dn, H):
    """Deterministic synthetic parameters (shapes from the module's __init__)."""
    def lin(k, fan_in, fan_out):
        kw, kb = jax.random.split(k)
        lim = 1.0 / jnp.sqrt(fan_in)
        w = jax.random.uniform(kw, (fan_in, fan_out), jnp.float32, -lim, lim)
        b = jax.random.uniform(kb, (1, fan_out), jnp.float32, -lim, lim)
        return w, b

    keys = jax.random.split(key, 7)
    p = {}
    p["we1"], p["be1"] = lin(keys[0], S + Dn, H)   # embedding_mlp fc1
    p["we2"], p["be2"] = lin(keys[1], H, H)        # embedding_mlp fc2
    p["wv1"], p["bv1"] = lin(keys[2], H, H)        # neighbor_value_mlp fc1
    p["wv2"], p["bv2"] = lin(keys[3], H, H)        # neighbor_value_mlp fc2
    p["wa1"], p["ba1"] = lin(keys[4], 2 * H, H)    # attention_mlp fc1
    p["wa2"], p["ba2"] = lin(keys[5], H, H)        # attention_mlp fc2
    p["wa3"], p["ba3"] = lin(keys[6], H, 1)        # attention_mlp fc3
    return p


if __name__ == "__main__":
    key = jax.random.PRNGKey(0)

    def run_case(B, S, Dn, H, N, k, force_path=None, max_tile_rows=None):
        obs_dim = S + Dn * N
        k_self, k_obs, k_par = jax.random.split(k, 3)
        self_obs = jax.random.normal(k_self, (B, S), jnp.float32)
        obs = jax.random.normal(k_obs, (B, obs_dim), jnp.float32)
        params = _init_params(k_par, S, Dn, H)

        fwd = jax.jit(functools.partial(
            quad_neighborhood_encoder_attention,
            self_obs_dim=S, neighbor_obs_dim=Dn, neighbor_hidden_size=H,
            num_use_neighbor_obs=N, batch_size=B,
            force_path=force_path, max_tile_rows=max_tile_rows))
        out = jax.block_until_ready(fwd(self_obs, obs, params))

        ref = _reference(self_obs, obs, params, S=S, Dn=Dn, H=H, N=N, B=B)
        assert out.shape == (B, H)
        max_abs = float(jnp.max(jnp.abs(out - ref)))
        rel_l2 = float(jnp.linalg.norm(out - ref) /
                       (jnp.linalg.norm(ref) + 1e-12))
        # bf16 matmul operands (f32 accumulation) => loosened tolerance vs f32 ref
        assert max_abs < 8e-2 and rel_l2 < 4e-2, (
            f"mismatch vs reference: max_abs={max_abs:.3e} rel_l2={rel_l2:.3e}")
        return out

    k1, k2, k3 = jax.random.split(key, 3)
    # small config -> fully fused single-kernel path (no HBM intermediates)
    run_case(B=4, S=18, Dn=6, H=32, N=6, k=k1)
    # moderate config -> still fused (whole problem is far below VMEM budget)
    run_case(B=256, S=18, Dn=6, H=32, N=6, k=k2)
    # force the tiled two-phase path (modular i%B BlockSpec, emb recompute,
    # 12-step "parallel" batch-tile grid) to exercise the large-B machinery
    run_case(B=384, S=18, Dn=6, H=32, N=6, k=k3, force_path="tiled",
             max_tile_rows=200)

    print("KERNEL_OK")
</pallas_src>

<mosaic_0001>
module attributes {stable_mosaic.version = 11 : i64} {
  func.func @_fused_kernel(%arg0: memref<4x18xbf16, #tpu.memory_space<vmem>>, %arg1: memref<24x6xbf16, #tpu.memory_space<vmem>>, %arg2: memref<18x32xbf16, #tpu.memory_space<vmem>>, %arg3: memref<6x32xbf16, #tpu.memory_space<vmem>>, %arg4: memref<1x32xf32, #tpu.memory_space<vmem>>, %arg5: memref<32x32xbf16, #tpu.memory_space<vmem>>, %arg6: memref<1x32xf32, #tpu.memory_space<vmem>>, %arg7: memref<32x32xbf16, #tpu.memory_space<vmem>>, %arg8: memref<32x64xbf16, #tpu.memory_space<vmem>>, %arg9: memref<1x64xf32, #tpu.memory_space<vmem>>, %arg10: memref<64x64xbf16, #tpu.memory_space<vmem>>, %arg11: memref<1x64xf32, #tpu.memory_space<vmem>>, %arg12: memref<1x64xf32, #tpu.memory_space<vmem>>, %arg13: memref<1x1xf32, #tpu.memory_space<vmem>>, %arg14: memref<4x32xf32, #tpu.memory_space<vmem>>) attributes {dimension_semantics = [], scalar_prefetch = 0 : i64, scratch_operands = 0 : i64, tpu.core_type = #tpu.core_type<tc>} {
    %c0 = arith.constant 0 : index
    %c0_0 = arith.constant 0 : index
    %0 = vector.load %arg0[%c0, %c0_0] : memref<4x18xbf16, #tpu.memory_space<vmem>>, vector<4x18xbf16>
    %c0_1 = arith.constant 0 : index
    %c0_2 = arith.constant 0 : index
    %1 = vector.load %arg2[%c0_1, %c0_2] : memref<18x32xbf16, #tpu.memory_space<vmem>>, vector<18x32xbf16>
    %cst = arith.constant dense<0.000000e+00> : vector<4x32xf32>
    %2 = tpu.matmul %0, %1, %cst {dimension_numbers = #tpu.dot_dimension_numbers<[1], [0], [0], [1], [0, 0, 1, 1], [], []>} : vector<4x18xbf16>, vector<18x32xbf16>, vector<4x32xf32> -> vector<4x32xf32>
    %3 = tpu.concatenate %2, %2, %2, %2, %2, %2 in 0 : vector<4x32xf32>, vector<4x32xf32>, vector<4x32xf32>, vector<4x32xf32>, vector<4x32xf32>, vector<4x32xf32> -> vector<24x32xf32>
    %c0_3 = arith.constant 0 : index
    %c0_4 = arith.constant 0 : index
    %4 = vector.load %arg1[%c0_3, %c0_4] : memref<24x6xbf16, #tpu.memory_space<vmem>>, vector<24x6xbf16>
    %c0_5 = arith.constant 0 : index
    %c0_6 = arith.constant 0 : index
    %5 = vector.load %arg3[%c0_5, %c0_6] : memref<6x32xbf16, #tpu.memory_space<vmem>>, vector<6x32xbf16>
    %c0_7 = arith.constant 0 : index
    %c0_8 = arith.constant 0 : index
    %6 = vector.load %arg4[%c0_7, %c0_8] : memref<1x32xf32, #tpu.memory_space<vmem>>, vector<1x32xf32>
    %c0_9 = arith.constant 0 : index
    %c0_10 = arith.constant 0 : index
    %7 = vector.load %arg5[%c0_9, %c0_10] : memref<32x32xbf16, #tpu.memory_space<vmem>>, vector<32x32xbf16>
    %c0_11 = arith.constant 0 : index
    %c0_12 = arith.constant 0 : index
    %8 = vector.load %arg6[%c0_11, %c0_12] : memref<1x32xf32, #tpu.memory_space<vmem>>, vector<1x32xf32>
    %cst_13 = arith.constant dense<0.000000e+00> : vector<24x32xf32>
    %9 = tpu.matmul %4, %5, %cst_13 {dimension_numbers = #tpu.dot_dimension_numbers<[1], [0], [0], [1], [0, 0, 1, 1], [], []>} : vector<24x6xbf16>, vector<6x32xbf16>, vector<24x32xf32> -> vector<24x32xf32>
    %10 = arith.addf %9, %3 : vector<24x32xf32>
    %11 = vector.broadcast %6 : vector<1x32xf32> to vector<24x32xf32>
    %12 = arith.addf %10, %11 : vector<24x32xf32>
    %13 = math.tanh %12 : vector<24x32xf32>
    %14 = arith.truncf %13 : vector<24x32xf32> to vector<24x32xbf16>
    %cst_14 = arith.constant dense<0.000000e+00> : vector<24x32xf32>
    %15 = tpu.matmul %14, %7, %cst_14 {dimension_numbers = #tpu.dot_dimension_numbers<[1], [0], [0], [1], [0, 0, 1, 1], [], []>} : vector<24x32xbf16>, vector<32x32xbf16>, vector<24x32xf32> -> vector<24x32xf32>
    %16 = vector.broadcast %8 : vector<1x32xf32> to vector<24x32xf32>
    %17 = arith.addf %15, %16 : vector<24x32xf32>
    %18 = math.tanh %17 : vector<24x32xf32>
    %19 = vector.shape_cast %18 : vector<24x32xf32> to vector<4x6x32xf32>
    %cst_15 = arith.constant dense<0.000000e+00> : vector<4x32xf32>
    %20 = vector.multi_reduction <add>, %19, %cst_15 [1] : vector<4x6x32xf32> to vector<4x32xf32>
    %cst_16 = arith.constant 6.000000e+00 : f32
    %21 = vector.broadcast %cst_16 : f32 to vector<4x32xf32>
    %22 = arith.divf %20, %21 : vector<4x32xf32>
    %23 = arith.truncf %22 : vector<4x32xf32> to vector<4x32xbf16>
    %c0_17 = arith.constant 0 : index
    %c0_18 = arith.constant 0 : index
    %24 = vector.load %arg7[%c0_17, %c0_18] : memref<32x32xbf16, #tpu.memory_space<vmem>>, vector<32x32xbf16>
    %cst_19 = arith.constant dense<0.000000e+00> : vector<4x32xf32>
    %25 = tpu.matmul %23, %24, %cst_19 {dimension_numbers = #tpu.dot_dimension_numbers<[1], [0], [0], [1], [0, 0, 1, 1], [], []>} : vector<4x32xbf16>, vector<32x32xbf16>, vector<4x32xf32> -> vector<4x32xf32>
    %26 = tpu.concatenate %25, %25, %25, %25, %25, %25 in 0 : vector<4x32xf32>, vector<4x32xf32>, vector<4x32xf32>, vector<4x32xf32>, vector<4x32xf32>, vector<4x32xf32> -> vector<24x32xf32>
    %c0_20 = arith.constant 0 : index
    %c0_21 = arith.constant 0 : index
    %27 = vector.load %arg8[%c0_20, %c0_21] : memref<32x64xbf16, #tpu.memory_space<vmem>>, vector<32x64xbf16>
    %c0_22 = arith.constant 0 : index
    %c0_23 = arith.constant 0 : index
    %28 = vector.load %arg9[%c0_22, %c0_23] : memref<1x64xf32, #tpu.memory_space<vmem>>, vector<1x64xf32>
    %c0_24 = arith.constant 0 : index
    %c0_25 = arith.constant 0 : index
    %29 = vector.load %arg10[%c0_24, %c0_25] : memref<64x64xbf16, #tpu.memory_space<vmem>>, vector<64x64xbf16>
    %c0_26 = arith.constant 0 : index
    %c0_27 = arith.constant 0 : index
    %30 = vector.load %arg11[%c0_26, %c0_27] : memref<1x64xf32, #tpu.memory_space<vmem>>, vector<1x64xf32>
    %c0_28 = arith.constant 0 : index
    %c0_29 = arith.constant 0 : index
    %31 = vector.load %arg12[%c0_28, %c0_29] : memref<1x64xf32, #tpu.memory_space<vmem>>, vector<1x64xf32>
    %c0_30 = arith.constant 0 : index
    %c0_31 = arith.constant 0 : index
    %32 = vector.load %arg13[%c0_30, %c0_31] : memref<1x1xf32, #tpu.memory_space<vmem>>, vector<1x1xf32>
    %33 = arith.truncf %18 : vector<24x32xf32> to vector<24x32xbf16>
    %cst_32 = arith.constant dense<0.000000e+00> : vector<24x64xf32>
    %34 = tpu.matmul %33, %27, %cst_32 {dimension_numbers = #tpu.dot_dimension_numbers<[1], [0], [0], [1], [0, 0, 1, 1], [], []>} : vector<24x32xbf16>, vector<32x64xbf16>, vector<24x64xf32> -> vector<24x64xf32>
    %cst_33 = arith.constant 0.000000e+00 : f32
    %35 = vector.broadcast %cst_33 : f32 to vector<24x32xf32>
    %36 = tpu.concatenate %35, %26 in 1 : vector<24x32xf32>, vector<24x32xf32> -> vector<24x64xf32>
    %37 = arith.addf %34, %36 : vector<24x64xf32>
    %38 = vector.broadcast %28 : vector<1x64xf32> to vector<24x64xf32>
    %39 = arith.addf %37, %38 : vector<24x64xf32>
    %40 = math.tanh %39 : vector<24x64xf32>
    %41 = arith.truncf %40 : vector<24x64xf32> to vector<24x64xbf16>
    %cst_34 = arith.constant dense<0.000000e+00> : vector<24x64xf32>
    %42 = tpu.matmul %41, %29, %cst_34 {dimension_numbers = #tpu.dot_dimension_numbers<[1], [0], [0], [1], [0, 0, 1, 1], [], []>} : vector<24x64xbf16>, vector<64x64xbf16>, vector<24x64xf32> -> vector<24x64xf32>
    %43 = vector.broadcast %30 : vector<1x64xf32> to vector<24x64xf32>
    %44 = arith.addf %42, %43 : vector<24x64xf32>
    %45 = math.tanh %44 : vector<24x64xf32>
    %46 = vector.broadcast %31 : vector<1x64xf32> to vector<24x64xf32>
    %47 = arith.mulf %45, %46 : vector<24x64xf32>
    %cst_35 = arith.constant dense<0.000000e+00> : vector<24xf32>
    %48 = vector.multi_reduction <add>, %47, %cst_35 [1] : vector<24x64xf32> to vector<24xf32>
    %49 = vector.shape_cast %48 : vector<24xf32> to vector<24x1xf32>
    %50 = vector.broadcast %32 : vector<1x1xf32> to vector<24x1xf32>
    %51 = arith.addf %49, %50 : vector<24x1xf32>
    %52 = vector.shape_cast %51 : vector<24x1xf32> to vector<4x6xf32>
    %cst_36 = arith.constant dense<0xFF800000> : vector<4xf32>
    %53 = vector.multi_reduction <maximumf>, %52, %cst_36 [1] : vector<4x6xf32> to vector<4xf32>
    %54 = vector.shape_cast %53 : vector<4xf32> to vector<4x1xf32>
    %55 = vector.broadcast %54 : vector<4x1xf32> to vector<4x6xf32>
    %56 = arith.subf %52, %55 : vector<4x6xf32>
    %57 = math.exp %56 : vector<4x6xf32>
    %cst_37 = arith.constant dense<0.000000e+00> : vector<4xf32>
    %58 = vector.multi_reduction <add>, %57, %cst_37 [1] : vector<4x6xf32> to vector<4xf32>
    %59 = vector.shape_cast %58 : vector<4xf32> to vector<4x1xf32>
    %60 = vector.broadcast %59 : vector<4x1xf32> to vector<4x6xf32>
    %61 = arith.divf %57, %60 : vector<4x6xf32>
    %62 = vector.extract_strided_slice %45 {offsets = [0, 0], sizes = [24, 32], strides = [1, 1]} : vector<24x64xf32> to vector<24x32xf32>
    %63 = vector.shape_cast %61 : vector<4x6xf32> to vector<24x1xf32>
    %64 = vector.broadcast %63 : vector<24x1xf32> to vector<24x32xf32>
    %65 = arith.mulf %62, %64 : vector<24x32xf32>
    %66 = vector.shape_cast %65 : vector<24x32xf32> to vector<4x6x32xf32>
    %cst_38 = arith.constant dense<0.000000e+00> : vector<4x32xf32>
    %67 = vector.multi_reduction <add>, %66, %cst_38 [1] : vector<4x6x32xf32> to vector<4x32xf32>
    %c0_39 = arith.constant 0 : index
    %c0_40 = arith.constant 0 : index
    %68 = vector.load %arg14[%c0_39, %c0_40] : memref<4x32xf32, #tpu.memory_space<vmem>>, vector<4x32xf32>
    tpu.vector_store %arg14[%c0_39, %c0_40], %67 {strides = array<i32>} : memref<4x32xf32, #tpu.memory_space<vmem>>, vector<4x32xf32>,
    return
  }
}

</mosaic_0001>

<bundles_post_ra>
// kernel: quad_neighborhood_encoder_attention.1
= control target key start
LH: loop header
LB: loop body
LE: loop exit
PB: predicated region body
PF: predicated region fallthrough
CT: control target
= control target key end

     0   :  { %s2428_s0 = inlined_call_operand.vmem [shape: bf16[4,18], index: 0, kind: input, shape index: {}]   ;;  %s2429_s1 = inlined_call_operand.vmem [shape: bf16[24,6], index: 1, kind: input, shape index: {}]   ;;  %s2430_s2 = inlined_call_operand.vmem [shape: bf16[18,32], index: 2, kind: input, shape index: {}]   ;;  %s2431_s3 = inlined_call_operand.vmem [shape: bf16[6,32], index: 3, kind: input, shape index: {}]   ;;  %s2432_s4 = inlined_call_operand.vmem [shape: f32[1,32], index: 4, kind: input, shape index: {}]   ;;  %s2433_s5 = inlined_call_operand.vmem [shape: bf16[32,32], index: 5, kind: input, shape index: {}]   ;;  %s2434_s6 = inlined_call_operand.vmem [shape: f32[1,32], index: 6, kind: input, shape index: {}]   ;;  %s2435_s7 = inlined_call_operand.vmem [shape: bf16[32,32], index: 7, kind: input, shape index: {}]   ;;  %s2436_s8 = inlined_call_operand.vmem [shape: bf16[32,64], index: 8, kind: input, shape index: {}]   ;;  %s2437_s9 = inlined_call_operand.vmem [shape: f32[1,64], index: 9, kind: input, shape index: {}]   ;;  %s2438_s10 = inlined_call_operand.vmem [shape: bf16[64,64], index: 10, kind: input, shape index: {}]   ;;  %s2439_s11 = inlined_call_operand.vmem [shape: f32[1,64], index: 11, kind: input, shape index: {}]   ;;  %s2440_s12 = inlined_call_operand.vmem [shape: f32[1,64], index: 12, kind: input, shape index: {}]   ;;  %s2441_s13 = inlined_call_operand.<no memory space> [shape: f32[1,1], index: 13, kind: input, shape index: {}]   ;;  %s2442_s14 = inlined_call_operand.hbm [shape: f32[4,32], index: 14, kind: output, shape index: {}]  }
   0x1   :  { %v19_v0 = vstv %s2441_s13 }
   0x2   :  { %20 = vst [vmem:[#allocation2] sm:$0x1] %v19_v0 }
   0x3   :  { %v1834_v1 = vld [vmem:[%s2430_s2] sm:$0xff]   ;;  %v1944_v2 = vmov 0.0   ;;  %vm142_vm0 = vcmask 1042432   ;;  %vm135_vm1 = vcmask 48128   ;;  %vm68_vm2 = vcmask 1040384  }
   0x4   :  { %1773 = vmatprep.subr.bf16.mxu0 %v1944_v2  ;;  %v120_v3 = vld [vmem:[%s2431_s3] sm:$0x7]  ;;  %v1836_v6 = vld [vmem:[%s2430_s2 + $0x8] ss:$0 sps:$4 sm:$0x11]   ;;  %vm1945_vm3 = vmmov 0  }
   0x5   :  { %v1835_v4 = vld [vmem:[%s2429_s1] sm:$0xff]   ;;  %1774 = vmatpush3.bf16.msra.mxu0 %v1834_v1  ;;  %1823 = vmatprep.subr.msk.bf16.mxu1 %vm142_vm0, %v120_v3  ;;  %v144_v5 = vsel %vm142_vm0, %v120_v3, 0  ;;  %v1837_v7 = vld [vmem:[%s2429_s1 + $0x8] ss:$0 sps:$4 sm:$0xff]   ;;  %v70_v9 = vsel %vm68_vm2, %v1836_v6, 0  ;;  %vm64_vm4 = vcmask 146432  }
   0x6   :  { %1782 = vmatpush3.bf16.msra.mxu1 %v144_v5  ;;  %1775 = vmatprep.subr.bf16.mxu0 %v1944_v2  ;;  %v51_v8 = vld [vmem:[%s2428_s0] sm:$0x3] }
   0x7   :  { %1783 = vmatprep.mubr.msk.bf16.mxu1 %vm135_vm1, %v1835_v4  ;;  %1777 = vmatprep.mubr.msk.bf16.mxu0 %vm1945_vm3, %v1944_v2 }
   0x9   :  { %1776 = vmatpush3.bf16.msra.mxu0 %v70_v9  ;;  %1784 = vmatmul.mubr.msk.bf16.vlgmr.msra.gmra.mrb[0].mxu1 %vm135_vm1, %v1837_v7 }
   0xc   :  { %1778 = vmatmul.mubr.msk.bf16.vlgmr.msra.gmra.mrb[0].mxu0 %vm64_vm4, %v51_v8 }
   0xd   :  { %21 = vsyncpa [#allocation4], 0  ;;  %v1838_v10 = vld [vmem:[%s2433_s5] sm:$0xff]   ;;  %v1839_v11 = vld [vmem:[%s2433_s5 + $0x8] sm:$0xff]   ;;  %vm115_vm5 = vcmask 1043456   ;;  %vm226_vm6 = vcmask 261120   ;;  %v291_v43 = vlaneseq }
   0xe   :  { %1787 = vmatprep.subr.bf16.mxu1 %v1838_v10  ;;  %v1727_v21 = vld [vmem:[%s2432_s4] ss:$0 sm:$0xff]  ;;  %v1841_v35 = vld [vmem:[%s2435_s7 + $0x8] sm:$0xff]   ;;  %v1946_v41 = vmov 1983009808   ;;  %vm406_vm7 = vcmask 259072  }
   0xf   :  { %1788 = vmatpush3.bf16.msra.mxu1 %v1838_v10  ;;  %v1840_v34 = vld [vmem:[%s2435_s7] sm:$0xff]   ;;  %v289_v42 = vunpack.c.l.s4 %v1946_v41  ;;  %v2084_v49 = vshrl.u32 %v291_v43, 7  ;;  %vm456_vm8 = vcmask 1041409   ;;  %vm458_vm9 = vcmask 1042434   ;;  %s1947_s22 = smov 32  }
  0x10   :  { %1789 = vmatprep.subr.bf16.mxu1 %v1839_v11  ;;  %v2077_v36 = vld [vmem:[%s2436_s8] sm:$0xff]   ;;  %vm460_vm10 = vcmask 1043459   ;;  %vm655_vm11 = vcmask 523264   ;;  %vm904_vm12 = vcmask 44032   ;;  %vm1704_vm13 = vcmask 257024  }
  0x11   :  { %v1728_v37 = vld [vmem:[%s2434_s6] ss:$0 sm:$0xff]  ;;  %v290_v48 = vunpack.c.0.s8 %v289_v42 }
  0x13   :  { %1790 = vmatpush3.bf16.msra.mxu1 %v1839_v11  ;;  %v2087_v50 = vsub.s32 %v290_v48, %v2084_v49 }
  0x14   :  { %1795 = vmatprep.subr.bf16.mxu1 %v1944_v2 }
  0xdc   :  { %v1785_v12 = vpop.f32.mrb[0].mxu1 }
  0xdd   :  { %v180_v13 = vpop.f32.mrb[1].mxu1 }
  0xde   :  { %v1786_v14 = vpop.f32.mrb[2].mxu1 }
  0xdf   :  { %v106_v15 = vpop.f32.mrb[0].mxu0  ;;  %v183_v16 = vpop.f32.mrb[3].mxu1 }
  0xe0   :  { %v113_v17 = vrot.slane %v106_v15, 4  ;;  %v1779_v18 = vpop.f32.mrb[1].mxu0 }
  0xe1   :  { %v109_v19 = vpop.f32.mrb[2].mxu0 }
  0xe2   :  { %v116_v20 = vsel %vm115_vm5, %v106_v15, %v113_v17  ;;  %v1780_v22 = vpop.f32.mrb[3].mxu0 }
  0xe3   :  { %v181_v23 = vadd.f32 %v180_v13, %v116_v20  ;;  %v189_v24 = vadd.f32 %v1785_v12, %v116_v20  ;;  %v184_v25 = vadd.f32 %v183_v16, %v116_v20 }
  0xe5   :  { %v200_v26 = vadd.f32 %v1727_v21, %v181_v23  ;;  %v201_v27 = vadd.f32 %v1727_v21, %v184_v25  ;;  %v202_v28 = vadd.f32 %v1727_v21, %v189_v24 }
  0xe7   :  { %1848 = vtanh.f32 %v200_v26 }
  0xe8   :  { %1850 = vtanh.f32 %v201_v27 }
  0xe9   :  { %1852 = vtanh.f32 %v202_v28 }
  0xf1   :  { %v1849_v29 = vpop.eup %1848 }
  0xf2   :  { %v1851_v30 = vpop.eup %1850 }
  0xf3   :  { %v1853_v31 = vpop.eup %1852  ;;  %v206_v32 = vpack.c.bf16 %v1851_v30, %v1849_v29 }
  0xf4   :  { %v207_v33 = vpack.c.bf16 %v1853_v31, %v1853_v31 }
  0xf5   :  { %1791 = vmatprep.mubr.msk.bf16.mxu1 %vm226_vm6, %v206_v32 }
  0xf6   :  { %1792 = vmatmul.mubr.msk.bf16.vlgmr.msra.gmra.mrb[4].mxu1 %vm226_vm6, %v207_v33 }
  0xf7   :  { %1799 = vmatprep.mubr.msk.bf16.mxu1 %vm1945_vm3, %v1944_v2  ;;  %1796 = vmatpush3.bf16.msra.mxu1 %v1840_v34 }
  0xf8   :  { %1797 = vmatprep.subr.bf16.mxu1 %v1944_v2 }
  0xfb   :  { %1798 = vmatpush3.bf16.msra.mxu1 %v1841_v35 }
  0xfc   :  { %1803 = vmatprep.subr.bf16.mxu1 %v2077_v36 }
 0x1c9   :  { %v1793_v38 = vpop.f32.mrb[4].mxu1 }
 0x1ca   :  { %v276_v39 = vadd.f32 %v1793_v38, %v1728_v37  ;;  %v267_v40 = vpop.f32.mrb[5].mxu1 }
 0x1cb   :  { %v268_v44 = vadd.f32 %v1728_v37, %v267_v40  ;;  %v1794_v45 = vpop.f32.mrb[6].mxu1 }
 0x1cc   :  { %1854 = vtanh.f32 %v276_v39  ;;  %v270_v46 = vpop.f32.mrb[7].mxu1 }
 0x1cd   :  { %1856 = vtanh.f32 %v268_v44  ;;  %v271_v47 = vadd.f32 %v1728_v37, %v270_v46 }
 0x1cf   :  { %1858 = vtanh.f32 %v271_v47 }
 0x1d6   :  { %v2089_v51 = vpop.eup %1854 }
 0x1d7   :  { %v2091_v52 = vpop.eup %1856  ;;  %v321_v53 = vcombine.high %v2089_v51, %v2089_v51  ;;  %v328_v54 = vrot.slane %v2089_v51, %v2087_v50 }
 0x1d8   :  { %v287_v55 = vcombine.high %v2091_v52, %v2091_v52  ;;  %v294_v56 = vrot.slane %v2091_v52, %v2087_v50 }
 0x1d9   :  { %v2101_v57 = vpop.eup %1858  ;;  %v335_v58 = vrot.slane %v321_v53, %v2087_v50  ;;  %v336_v59 = vcombine.high %v328_v54, %v328_v54  ;;  %v384_v18 = vrot.slane %v328_v54, %v2087_v50 }
 0x1da   :  { %v301_v60 = vrot.slane %v287_v55, %v2087_v50  ;;  %v302_v61 = vcombine.high %v294_v56, %v294_v56  ;;  %v304_v62 = vcombine.high %v2101_v57, %v2101_v57  ;;  %v311_v63 = vrot.slane %v2101_v57, %v2087_v50 }
 0x1db   :  { %v337_v0 = vcombine.high %v335_v58, %v335_v58  ;;  %v386_v1 = vcombine.low %v336_v59, %v335_v58  ;;  %v538_v2 = vpack.c.bf16 %v2101_v57, %v2091_v52 }
 0x1dc   :  { %v338_v3 = vcombine.low %v294_v56, %v302_v61  ;;  %v303_v4 = vcombine.high %v301_v60, %v301_v60  ;;  %v318_v5 = vrot.slane %v304_v62, %v2087_v50  ;;  %v319_v6 = vcombine.high %v311_v63, %v311_v63 }
 0x1dd   :  { %v393_v7 = vrot.slane %v386_v1, %v2087_v50  ;;  %v400_v8 = vrot.slane %v337_v0, %v2087_v50  ;;  %v352_v10 = vrot.slane %v301_v60, %v2087_v50 }
 0x1de   :  { %v345_v9 = vrot.slane %v338_v3, %v2087_v50  ;;  %v320_v11 = vcombine.high %v318_v5, %v318_v5  ;;  %v354_v12 = vcombine.low %v303_v4, %v311_v63  ;;  %v368_v15 = vrot.slane %v319_v6, %v2087_v50 }
 0x1df   :  { %v401_v13 = vcombine.low %v393_v7, %v400_v8 }
 0x1e0   :  { %v361_v14 = vrot.slane %v354_v12, %v2087_v50  ;;  %v370_v16 = vcombine.low %v318_v5, %v320_v11  ;;  %v353_v17 = vcombine.low %v345_v9, %v352_v10  ;;  %v1843_v10 = vld [vmem:[%s2436_s8 + $0x8] sm:$0xff]   ;;  %v539_v11 = vpack.c.bf16 %v2089_v51, %v2089_v51  ;;  %v1844_v12 = vld [vmem:[%s2438_s10] sm:$0xff]   ;;  %v1846_v51 = vld [vmem:[%s2438_s10 + $0x10] sm:$0xff]  }
 0x1e1   :  { %v428_v19 = vsel %vm406_vm7, %v401_v13, 0.0  ;;  %1811 = vmatprep.subr.bf16.mxu0 %v1844_v12 }
 0x1e2   :  { %v369_v20 = vcombine.low %v361_v14, %v368_v15  ;;  %v377_v21 = vrot.slane %v370_v16, %v2087_v50  ;;  %v407_v22 = vsel %vm406_vm7, %v353_v17, 0.0  ;;  %v429_v23 = vrot.slane %v428_v19, 4  ;;  %1812 = vmatpush3.bf16.msra.mxu0 %v1844_v12  ;;  %v1847_v16 = vld [vmem:[%s2438_s10 + $0x18] sm:$0xff]  }
 0x1e3   :  { %v408_v24 = vrot.slane %v407_v22, 4 }
 0x1e4   :  { %v385_v25 = vcombine.low %v377_v21, %v384_v18  ;;  %v414_v26 = vsel %vm406_vm7, %v369_v20, 0.0  ;;  %v430_v27 = vadd.f32 %v429_v23, %v428_v19 }
 0x1e5   :  { %v409_v28 = vadd.f32 %v408_v24, %v407_v22  ;;  %v415_v29 = vrot.slane %v414_v26, 4  ;;  %v1740_v22 = vld [vmem:[%s2437_s9] ss:$0 sm:$0xff] }
 0x1e6   :  { %v421_v30 = vsel %vm406_vm7, %v385_v25, 0.0  ;;  %v431_v31 = vrot.slane %v430_v27, 2 }
 0x1e7   :  { %v410_v32 = vrot.slane %v409_v28, 2  ;;  %v416_v33 = vadd.f32 %v415_v29, %v414_v26  ;;  %v422_v34 = vrot.slane %v421_v30, 4 }
 0x1e8   :  { %v432_v35 = vadd.f32 %v431_v31, %v430_v27 }
 0x1e9   :  { %v411_v37 = vadd.f32 %v410_v32, %v409_v28  ;;  %v417_v38 = vrot.slane %v416_v33, 2  ;;  %v423_v39 = vadd.f32 %v422_v34, %v421_v30 }
 0x1ea   :  { %v433_v40 = vrot.slane %v432_v35, 1 }
 0x1eb   :  { %v412_v41 = vrot.slane %v411_v37, 1  ;;  %v418_v42 = vadd.f32 %v417_v38, %v416_v33  ;;  %v424_v44 = vrot.slane %v423_v39, 2 }
 0x1ec   :  { %v434_v45 = vadd.f32 %v433_v40, %v432_v35  ;;  %v1741_v35 = vld [vmem:[%s2439_s11] ss:$0 sm:$0xff]  ;;  %s1951_s11 = smov [#allocation3]  }
 0x1ed   :  { %v413_v46 = vadd.f32 %v412_v41, %v411_v37  ;;  %v419_v47 = vrot.slane %v418_v42, 1  ;;  %v425_v48 = vadd.f32 %v424_v44, %v423_v39 }
 0x1ee   :  { %v439_v56 = vmul.f32 0.16666667, %v434_v45  ;;  %v1748_v45 = vld [vmem:[%s2440_s12] ss:$0 sm:$0xff]  ;;  %s1712_s12 = sshll.u32 %s1951_s11, 4  ;;  %s1713_s12 = int_to_ptr.vmem [resolvable:$true] %s1712_s12 }
 0x1ef   :  { %v420_v53 = vadd.f32 %v419_v47, %v418_v42  ;;  %v426_v54 = vrot.slane %v425_v48, 1  ;;  %v436_v55 = vmul.f32 0.16666667, %v413_v46  ;;  %s1920_s26 = scalar_lea.vmem %s1713_s12, 64  ;;  %p1925_p1 = scmp.lt.s32.totalorder %s1713_s12, %s1713_s12 }
 0x1f0   :  { %v443_v63 = vpack.c.bf16 %v439_v56, %v439_v56  ;;  %p1921_p0 = scmp.ne.s32.totalorder %s1713_s12, %s1920_s26  ;;  %p1926_p2 = scmp.lt.s32.totalorder %s1920_s26, %s1920_s26 }
 0x1f1   :  { %v427_v58 = vadd.f32 %v426_v54, %v425_v48  ;;  %v437_v59 = vmul.f32 0.16666667, %v420_v53  ;;  %v440_v60 = vpack.c.bf16 %v436_v55, %v436_v55 }
 0x1f2   :  { %v455_v6 = vunpack.c.l.b16 %v443_v63  ;;  %p1927_p3 = por %p1926_p2, %p1925_p1 }
 0x1f3   :  { %v438_v61 = vmul.f32 0.16666667, %v427_v58  ;;  %v441_v62 = vpack.c.bf16 %v437_v59, %v437_v59  ;;  %v452_v1 = vunpack.c.l.b16 %v440_v60  ;;  %v1948_v60 = vmov 0  }
 0x1f4   :  { %1832 = vset.pattern.permute.xlu1 %v1948_v60  ;;  %1833 = vset.pattern.permute.xlu0 %v1948_v60  ;;  %p1928_p4 = pnand %p1927_p3, %p1921_p0 }
 0x1f5   :  { %v442_v0 = vpack.c.bf16 %v438_v61, %v438_v61  ;;  %v453_v3 = vunpack.c.l.b16 %v441_v62  ;;  %v1749_v61 = vld [vmem:[#allocation2] ss:$0 sm:$0xff] }
 0x1f7   :  { %v454_v4 = vunpack.c.l.b16 %v442_v0  ;;  %v457_v5 = vsel %vm456_vm8, %v453_v3, %v452_v1 }
 0x1f9   :  { %v459_v7 = vsel %vm458_vm9, %v454_v4, %v457_v5 }
 0x1fa   :  { %v461_v8 = vsel %vm460_vm10, %v455_v6, %v459_v7 }
 0x1fb   :  { %v462_v9 = vpack.c.b16 %v461_v8, %v461_v8 }
 0x1fd   :  { %1800 = vmatmul.mubr.msk.bf16.vlgmr.msra.gmra.mrb[8].mxu1 %vm226_vm6, %v462_v9 }
 0x1fe   :  { %1804 = vmatpush3.bf16.msra.mxu1 %v2077_v36  ;;  %1807 = vmatprep.mubr.msk.bf16.mxu1 %vm226_vm6, %v538_v2  ;;  %v1845_v36 = vld [vmem:[%s2438_s10 + $0x8] sm:$0xff]  }
 0x1ff   :  { %1805 = vmatprep.subr.bf16.mxu1 %v1843_v10  ;;  %1813 = vmatprep.subr.bf16.mxu0 %v1845_v36 }
 0x200   :  { %1814 = vmatpush3.bf16.msra.mxu0 %v1845_v36 }
 0x201   :  { %1815 = vmatprep.subr.bf16.mxu0 %v1846_v51 }
 0x202   :  { %1806 = vmatpush3.bf16.msra.mxu1 %v1843_v10 }
 0x204   :  { %1816 = vmatpush3.bf16.msra.mxu0 %v1846_v51 }
 0x205   :  { %1808 = vmatmul.mubr.msk.bf16.vlgmr.msra.gmra.mrb[12].mxu1 %vm226_vm6, %v539_v11  ;;  %1817 = vmatprep.subr.bf16.mxu0 %v1847_v16 }
 0x208   :  { %1818 = vmatpush3.bf16.msra.mxu0 %v1847_v16 }
 0x2d0   :  { %v512_v52 = vpop.f32.mrb[8].mxu1 }
 0x2d1   :  { %v519_v57 = vrot.slane %v512_v52, 4  ;;  %v1801_v2 = vpop.f32.mrb[9].mxu1 }
 0x2d2   :  { %v515_v13 = vpop.f32.mrb[10].mxu1 }
 0x2d3   :  { %v1802_v14 = vpop.f32.mrb[11].mxu1  ;;  %v521_v15 = vsel %vm115_vm5, %v512_v52, %v519_v57 }
 0x2d4   :  { %541 = vrot.lane.b32.xlu0 %v521_v15, %s1947_s22 }
 0x2d8   :  { %v1809_v17 = vpop.f32.mrb[12].mxu1 }
 0x2d9   :  { %v597_v18 = vpop.f32.mrb[13].mxu1 }
 0x2da   :  { %v1810_v19 = vpop.f32.mrb[14].mxu1 }
 0x2db   :  { %v600_v20 = vpop.f32.mrb[15].mxu1 }
 0x346   :  { %v542_v21 = vpop.permute.xlu0 %541 }
 0x347   :  { %v544_v23 = vsel %vm226_vm6, 0.0, %v542_v21 }
 0x348   :  { %v598_v24 = vadd.f32 %v597_v18, %v544_v23  ;;  %v606_v25 = vadd.f32 %v1809_v17, %v544_v23  ;;  %v601_v26 = vadd.f32 %v600_v20, %v544_v23 }
 0x34a   :  { %v617_v27 = vadd.f32 %v1740_v22, %v598_v24  ;;  %v618_v28 = vadd.f32 %v1740_v22, %v601_v26  ;;  %v619_v29 = vadd.f32 %v1740_v22, %v606_v25 }
 0x34c   :  { %1860 = vtanh.f32 %v617_v27 }
 0x34d   :  { %1862 = vtanh.f32 %v618_v28 }
 0x34e   :  { %1864 = vtanh.f32 %v619_v29 }
 0x356   :  { %v1861_v30 = vpop.eup %1860 }
 0x357   :  { %v1863_v31 = vpop.eup %1862 }
 0x358   :  { %v1865_v32 = vpop.eup %1864  ;;  %v623_v33 = vpack.c.bf16 %v1863_v31, %v1861_v30 }
 0x359   :  { %v624_v34 = vpack.c.bf16 %v1865_v32, %v1865_v32  ;;  %v883_v32 = vand.u32 127, %v291_v43 }
 0x35a   :  { %1819 = vmatprep.mubr.msk.bf16.mxu0 %vm655_vm11, %v623_v33 }
 0x35b   :  { %1820 = vmatmul.mubr.msk.bf16.vlgmr.msra.gmra.mrb[4].mxu0 %vm655_vm11, %v624_v34  ;;  %v2240_v34 = vsub.s32 %v883_v32, %v2084_v49 }
 0x42e   :  { %v1821_v37 = vpop.f32.mrb[4].mxu0 }
 0x42f   :  { %v705_v38 = vadd.f32 %v1821_v37, %v1741_v35  ;;  %v696_v39 = vpop.f32.mrb[5].mxu0 }
 0x430   :  { %v697_v40 = vadd.f32 %v1741_v35, %v696_v39  ;;  %v1822_v41 = vpop.f32.mrb[6].mxu0 }
 0x431   :  { %v699_v42 = vpop.f32.mrb[7].mxu0 }
 0x432   :  { %1866 = vtanh.f32 %v697_v40  ;;  %v700_v44 = vadd.f32 %v1741_v35, %v699_v42 }
 0x433   :  { %1868 = vtanh.f32 %v705_v38 }
 0x434   :  { %1870 = vtanh.f32 %v700_v44 }
 0x43c   :  { %v2164_v46 = vpop.eup %1866 }
 0x43d   :  { %v2166_v47 = vpop.eup %1868  ;;  %v719_v48 = vmul.f32 %v2164_v46, %v1748_v45 }
 0x43e   :  { %v2169_v53 = vpop.eup %1870  ;;  %v721_v58 = vmul.f32 %v2166_v47, %v1748_v45 }
 0x43f   :  { %v722_v54 = vsel %vm655_vm11, %v719_v48, 0.0  ;;  %v720_v55 = vmul.f32 %v2169_v53, %v1748_v45  ;;  %v1949_v48 = vmov 269488144  }
 0x440   :  { %723 = vadd.xlane.f32.xlu0 %v722_v54  ;;  %v728_v59 = vsel %vm655_vm11, %v721_v58, 0.0  ;;  %v910_v54 = vunpack.c.l.s4 %v1949_v48 }
 0x441   :  { %v725_v56 = vsel %vm655_vm11, %v720_v55, 0.0  ;;  %v1950_v55 = vmov 842150450  }
 0x442   :  { %726 = vadd.xlane.f32.xlu1 %v725_v56  ;;  %v917_v56 = vunpack.c.l.s4 %v1950_v55  ;;  %v911_v58 = vunpack.c.0.s8 %v910_v54 }
 0x444   :  { %v2251_v60 = vsub.s32 %v911_v58, %v2084_v49 }
 0x446   :  { %729 = vadd.xlane.f32.xlu1 %v728_v59  ;;  %v918_v59 = vunpack.c.0.s8 %v917_v56 }
 0x4cd   :  { %v724_v62 = vpop.xlane.xlu0 %723 }
 0x4ce   :  { %v737_v63 = vadd.f32 %v1749_v61, %v724_v62 }
 0x4cf   :  { %v727_v0 = vpop.xlane.xlu1 %726 }
 0x4d0   :  { %v743_v1 = vcombine.high %v737_v63, %v737_v63  ;;  %v2177_v3 = vrot.slane %v737_v63, %v2087_v50  ;;  %v738_v4 = vadd.f32 %v1749_v61, %v727_v0 }
 0x4d2   :  { %v2180_v5 = vrot.slane %v743_v1, %v2087_v50  ;;  %v2184_v6 = vcombine.high %v2177_v3, %v2177_v3  ;;  %v760_v7 = vcombine.high %v738_v4, %v738_v4  ;;  %v2187_v8 = vrot.slane %v738_v4, %v2087_v50 }
 0x4d3   :  { %v730_v9 = vpop.xlane.xlu1 %729  ;;  %v940_v4 = vsub.s32 1, %v2084_v49 }
 0x4d4   :  { %v806_v10 = vcombine.low %v2177_v3, %v2184_v6  ;;  %v2193_v11 = vcombine.high %v2180_v5, %v2180_v5  ;;  %v2196_v12 = vrot.slane %v760_v7, %v2087_v50  ;;  %v2200_v36 = vcombine.high %v2187_v8, %v2187_v8 }
 0x4d5   :  { %v739_v52 = vadd.f32 %v1749_v61, %v730_v9  ;;  %v820_v51 = vrot.slane %v2180_v5, %v2087_v50  ;;  %v2254_v61 = vsub.s32 %v918_v59, %v2084_v49  ;;  %v933_v7 = vsub.s32 0, %v2084_v49 }
 0x4d6   :  { %v2204_v57 = vcombine.high %v2196_v12, %v2196_v12  ;;  %v822_v2 = vcombine.low %v2193_v11, %v2187_v8  ;;  %v813_v13 = vrot.slane %v806_v10, %v2087_v50  ;;  %v836_v21 = vrot.slane %v2200_v36, %v2087_v50 }
 0x4d7   :  { %v777_v14 = vcombine.high %v739_v52, %v739_v52  ;;  %v2212_v15 = vrot.slane %v739_v52, %v2087_v50 }
 0x4d8   :  { %v821_v16 = vcombine.low %v813_v13, %v820_v51  ;;  %v829_v17 = vrot.slane %v822_v2, %v2087_v50  ;;  %v838_v18 = vcombine.low %v2196_v12, %v2204_v57  ;;  %v947_v2 = vsub.s32 2, %v2084_v49 }
 0x4d9   :  { %v2218_v19 = vrot.slane %v777_v14, %v2087_v50  ;;  %v2222_v20 = vcombine.high %v2212_v15, %v2212_v15  ;;  %v852_v26 = vrot.slane %v2212_v15, %v2087_v50  ;;  %v954_v51 = vsub.s32 3, %v2084_v49 }
 0x4da   :  { %871 = vperm.xlu1 %1832, %v821_v16   ;;  %v837_v22 = vcombine.low %v829_v17, %v836_v21  ;;  %v845_v23 = vrot.slane %v838_v18, %v2087_v50 }
 0x4db   :  { %v2229_v24 = vcombine.high %v2218_v19, %v2218_v19  ;;  %v854_v25 = vcombine.low %v2222_v20, %v2218_v19 }
 0x4dc   :  { %v853_v27 = vcombine.low %v845_v23, %v852_v26 }
 0x4dd   :  { %v861_v28 = vrot.slane %v854_v25, %v2087_v50  ;;  %v868_v29 = vrot.slane %v2229_v24, %v2087_v50 }
 0x4de   :  { %874 = vperm.xlu1 %1832, %v837_v22  }
 0x4df   :  { %v869_v30 = vcombine.low %v861_v28, %v868_v29 }
 0x4e2   :  { %877 = vperm.xlu1 %1832, %v853_v27  }
 0x4e6   :  { %880 = vperm.xlu1 %1832, %v869_v30  }
 0x559   :  { %v872_v31 = vpop.permute.xlu1 %871 }
 0x55a   :  { %v887_v39 = vrot.slane %v872_v31, %v2240_v34 }
 0x55d   :  { %v875_v33 = vpop.permute.xlu1 %874 }
 0x55e   :  { %v891_v37 = vrot.slane %v875_v33, %v2240_v34 }
 0x560   :  { %v900_v41 = vsel %vm456_vm8, %v891_v37, %v887_v39 }
 0x561   :  { %v878_v35 = vpop.permute.xlu1 %877 }
 0x562   :  { %v895_v38 = vrot.slane %v878_v35, %v2240_v34 }
 0x564   :  { %v901_v44 = vsel %vm458_vm9, %v895_v38, %v900_v41 }
 0x565   :  { %v881_v40 = vpop.permute.xlu1 %880 }
 0x566   :  { %v899_v42 = vrot.slane %v881_v40, %v2240_v34 }
 0x568   :  { %v902_v43 = vsel %vm460_vm10, %v899_v42, %v901_v44 }
 0x569   :  { %v905_v45 = vsel %vm904_vm12, %v902_v43, -inf }
 0x56a   :  { %906 = vmax.xlane.f32.xlu0 %v905_v45 }
 0x5f7   :  { %v907_v62 = vpop.xlane.xlu0 %906 }
 0x5f8   :  { %v915_v63 = vrot.slane %v907_v62, %v2251_v60  ;;  %v922_v0 = vrot.slane %v907_v62, %v2254_v61 }
 0x5fa   :  { %v923_v1 = vcombine.low %v915_v63, %v922_v0 }
 0x5fc   :  { %v930_v9 = vrot.slane %v923_v1, %v2087_v50 }
 0x5fe   :  { %v941_v10 = vrot.slane %v930_v9, %v940_v4  ;;  %v934_v52 = vrot.slane %v930_v9, %v933_v7  ;;  %v948_v13 = vrot.slane %v930_v9, %v947_v2  ;;  %v955_v14 = vrot.slane %v930_v9, %v954_v51 }
 0x600   :  { %943 = vbcast.lane.b32.xlu0 %v941_v10, 256  ;;  %936 = vbcast.lane.b32.xlu1 %v934_v52, 256 }
 0x604   :  { %950 = vbcast.lane.b32.xlu1 %v948_v13, 256 }
 0x608   :  { %957 = vbcast.lane.b32.xlu1 %v955_v14, 256 }
 0x672   :  { %v944_v16 = vpop.permute.xlu0 %943  ;;  %v937_v17 = vpop.permute.xlu1 %936 }
 0x673   :  { %v975_v18 = vcombine.high %v944_v16, %v944_v16  ;;  %v982_v21 = vrot.slane %v944_v16, %v2087_v50  ;;  %v959_v22 = vcombine.high %v937_v17, %v937_v17  ;;  %v966_v23 = vrot.slane %v937_v17, %v2087_v50 }
 0x675   :  { %v989_v25 = vrot.slane %v975_v18, %v2087_v50  ;;  %v990_v26 = vcombine.high %v982_v21, %v982_v21  ;;  %v1038_v27 = vsub.f32 %v2193_v11, %v982_v21  ;;  %v973_v28 = vrot.slane %v959_v22, %v2087_v50 }
 0x676   :  { %v974_v29 = vcombine.high %v966_v23, %v966_v23  ;;  %v1035_v30 = vsub.f32 %v2177_v3, %v966_v23  ;;  %v951_v31 = vpop.permute.xlu1 %950 }
 0x677   :  { %v1039_v32 = vsub.f32 %v2187_v8, %v990_v26  ;;  %v1040_v33 = vsub.f32 %v2200_v36, %v989_v25  ;;  %v1053_v35 = vmul.f32 1.442695, %v1038_v27  ;;  %v1037_v37 = vsub.f32 %v2180_v5, %v973_v28 }
 0x678   :  { %v1036_v38 = vsub.f32 %v2184_v6, %v974_v29  ;;  %v1047_v39 = vmul.f32 1.442695, %v1035_v30  ;;  %v991_v40 = vcombine.high %v951_v31, %v951_v31  ;;  %v998_v41 = vrot.slane %v951_v31, %v2087_v50 }
 0x679   :  { %1872 = vpow2.f32 %v1053_v35  ;;  %v1055_v11 = vmul.f32 1.442695, %v1039_v32  ;;  %v1057_v42 = vmul.f32 1.442695, %v1040_v33  ;;  %v1051_v43 = vmul.f32 1.442695, %v1037_v37 }
 0x67a   :  { %v1049_v44 = vmul.f32 1.442695, %v1036_v38  ;;  %v1005_v3 = vrot.slane %v991_v40, %v2087_v50  ;;  %v1006_v45 = vcombine.high %v998_v41, %v998_v41  ;;  %v958_v8 = vpop.permute.xlu1 %957  ;;  %v1041_v36 = vsub.f32 %v2196_v12, %v998_v41 }
 0x67b   :  { %1874 = vpow2.f32 %v1055_v11  ;;  %v1007_v48 = vcombine.high %v958_v8, %v958_v8  ;;  %v1014_v5 = vrot.slane %v958_v8, %v2087_v50 }
 0x67c   :  { %1876 = vpow2.f32 %v1047_v39  ;;  %v1042_v6 = vsub.f32 %v2204_v57, %v1006_v45  ;;  %v1043_v54 = vsub.f32 %v2212_v15, %v1005_v3  ;;  %v1059_v55 = vmul.f32 1.442695, %v1041_v36 }
 0x67d   :  { %1878 = vpow2.f32 %v1049_v44  ;;  %v1021_v56 = vrot.slane %v1007_v48, %v2087_v50  ;;  %v1022_v58 = vcombine.high %v1014_v5, %v1014_v5  ;;  %v1044_v62 = vsub.f32 %v2222_v20, %v1014_v5 }
 0x67e   :  { %1880 = vpow2.f32 %v1051_v43  ;;  %v1061_v59 = vmul.f32 1.442695, %v1042_v6  ;;  %v1063_v57 = vmul.f32 1.442695, %v1043_v54 }
 0x67f   :  { %1882 = vpow2.f32 %v1057_v42  ;;  %v1045_v12 = vsub.f32 %v2218_v19, %v1022_v58  ;;  %v1046_v63 = vsub.f32 %v2229_v24, %v1021_v56  ;;  %v1065_v0 = vmul.f32 1.442695, %v1044_v62 }
 0x680   :  { %1884 = vpow2.f32 %v1061_v59 }
 0x681   :  { %1886 = vpow2.f32 %v1059_v55  ;;  %v1067_v1 = vmul.f32 1.442695, %v1045_v12  ;;  %v1069_v15 = vmul.f32 1.442695, %v1046_v63 }
 0x682   :  { %1888 = vpow2.f32 %v1065_v0 }
 0x683   :  { %v2291_v9 = vpop.eup %1872  ;;  %1890 = vpow2.f32 %v1067_v1 }
 0x684   :  { %1892 = vpow2.f32 %v1069_v15 }
 0x685   :  { %v2293_v10 = vpop.eup %1874  ;;  %1894 = vpow2.f32 %v1063_v57 }
 0x686   :  { %v2295_v20 = vpop.eup %1876  ;;  %v1099_v13 = vcombine.low %v2291_v9, %v2293_v10 }
 0x687   :  { %v2297_v52 = vpop.eup %1878 }
 0x688   :  { %v2299_v19 = vpop.eup %1880  ;;  %v1083_v24 = vcombine.low %v2295_v20, %v2297_v52  ;;  %v1106_v25 = vrot.slane %v1099_v13, %v2087_v50 }
 0x689   :  { %v2305_v14 = vpop.eup %1882  ;;  %v1097_v18 = vrot.slane %v2299_v19, %v2087_v50 }
 0x68a   :  { %v2307_v16 = vpop.eup %1884  ;;  %v1090_v17 = vrot.slane %v1083_v24, %v2087_v50  ;;  %v1113_v29 = vrot.slane %v2305_v14, %v2087_v50 }
 0x68b   :  { %v2312_v21 = vpop.eup %1886 }
 0x68c   :  { %v2314_v22 = vpop.eup %1888  ;;  %v1098_v23 = vcombine.low %v1090_v17, %v1097_v18  ;;  %v1115_v26 = vcombine.low %v2312_v21, %v2307_v16  ;;  %v1114_v32 = vcombine.low %v1106_v25, %v1113_v29 }
 0x68d   :  { %v2319_v27 = vpop.eup %1890 }
 0x68e   :  { %v2321_v28 = vpop.eup %1892  ;;  %1148 = vperm.xlu1 %1832, %v1098_v23   ;;  %v1131_v30 = vcombine.low %v2314_v22, %v2319_v27  ;;  %v1122_v33 = vrot.slane %v1115_v26, %v2087_v50 }
 0x68f   :  { %v2327_v31 = vpop.eup %1894  ;;  %v1145_v37 = vrot.slane %v2321_v28, %v2087_v50 }
 0x690   :  { %v1138_v35 = vrot.slane %v1131_v30, %v2087_v50  ;;  %v1129_v38 = vrot.slane %v2327_v31, %v2087_v50 }
 0x692   :  { %1151 = vperm.xlu1 %1832, %v1114_v32   ;;  %v1146_v39 = vcombine.low %v1138_v35, %v1145_v37  ;;  %v1130_v40 = vcombine.low %v1122_v33, %v1129_v38 }
 0x694   :  { %1157 = vperm.xlu0 %1833, %v1146_v39  }
 0x696   :  { %1154 = vperm.xlu1 %1832, %v1130_v40  }
 0x70d   :  { %v1149_v41 = vpop.permute.xlu1 %1148 }
 0x70e   :  { %v1162_v43 = vrot.slane %v1149_v41, %v2240_v34 }
 0x711   :  { %v1152_v11 = vpop.permute.xlu1 %1151 }
 0x712   :  { %v1166_v42 = vrot.slane %v1152_v11, %v2240_v34 }
 0x713   :  { %v1158_v44 = vpop.permute.xlu0 %1157 }
 0x714   :  { %v1174_v3 = vrot.slane %v1158_v44, %v2240_v34  ;;  %v1175_v36 = vsel %vm456_vm8, %v1166_v42, %v1162_v43 }
 0x715   :  { %v1155_v45 = vpop.permute.xlu1 %1154 }
 0x716   :  { %v1170_v8 = vrot.slane %v1155_v45, %v2240_v34 }
 0x718   :  { %v1176_v48 = vsel %vm458_vm9, %v1170_v8, %v1175_v36 }
 0x719   :  { %v1177_v5 = vsel %vm460_vm10, %v1174_v3, %v1176_v48 }
 0x71a   :  { %v1179_v6 = vsel %vm904_vm12, %v1177_v5, 0.0 }
 0x71b   :  { %1180 = vadd.xlane.f32.xlu1 %v1179_v6 }
 0x7a8   :  { %v1181_v54 = vpop.xlane.xlu1 %1180 }
 0x7a9   :  { %v1189_v55 = vrot.slane %v1181_v54, %v2251_v60  ;;  %v1196_v56 = vrot.slane %v1181_v54, %v2254_v61 }
 0x7ab   :  { %v1197_v58 = vcombine.low %v1189_v55, %v1196_v56 }
 0x7ad   :  { %v1204_v59 = vrot.slane %v1197_v58, %v2087_v50 }
 0x7af   :  { %v1208_v34 = vrot.slane %v1204_v59, %v933_v7  ;;  %v1215_v62 = vrot.slane %v1204_v59, %v940_v4  ;;  %v1222_v12 = vrot.slane %v1204_v59, %v947_v2  ;;  %v1229_v63 = vrot.slane %v1204_v59, %v954_v51 }
 0x7b1   :  { %1210 = vbcast.lane.b32.xlu0 %v1208_v34, 256 }
 0x7b5   :  { %1217 = vbcast.lane.b32.xlu0 %v1215_v62, 256 }
 0x7b9   :  { %1224 = vbcast.lane.b32.xlu0 %v1222_v12, 256 }
 0x7bd   :  { %1231 = vbcast.lane.b32.xlu0 %v1229_v63, 256 }
 0x823   :  { %v1211_v61 = vpop.permute.xlu0 %1210 }
 0x824   :  { %v1240_v0 = vrot.slane %v1211_v61, %v2087_v50  ;;  %v1233_v1 = vcombine.high %v1211_v61, %v1211_v61 }
 0x826   :  { %1896 = vrcp.f32 %v1240_v0  ;;  %v1248_v4 = vcombine.high %v1240_v0, %v1240_v0  ;;  %v1247_v2 = vrot.slane %v1233_v1, %v2087_v50 }
 0x827   :  { %v1218_v57 = vpop.permute.xlu0 %1217 }
 0x828   :  { %v1256_v7 = vrot.slane %v1218_v57, %v2087_v50  ;;  %v1249_v13 = vcombine.high %v1218_v57, %v1218_v57 }
 0x82a   :  { %1898 = vrcp.f32 %v1256_v7  ;;  %v1264_v17 = vcombine.high %v1256_v7, %v1256_v7  ;;  %v1263_v26 = vrot.slane %v1249_v13, %v2087_v50 }
 0x82b   :  { %v1225_v15 = vpop.permute.xlu0 %1224 }
 0x82c   :  { %v1272_v24 = vrot.slane %v1225_v15, %v2087_v50  ;;  %v1265_v35 = vcombine.high %v1225_v15, %v1225_v15 }
 0x82e   :  { %1900 = vrcp.f32 %v1272_v24  ;;  %v1280_v37 = vcombine.high %v1272_v24, %v1272_v24  ;;  %v1279_v40 = vrot.slane %v1265_v35, %v2087_v50 }
 0x82f   :  { %v1232_v49 = vpop.permute.xlu0 %1231  ;;  %1902 = vrcp.f32 %v1248_v4 }
 0x830   :  { %v1897_v51 = vpop.eup %1896  ;;  %v1281_v18 = vcombine.high %v1232_v49, %v1232_v49  ;;  %v1288_v23 = vrot.slane %v1232_v49, %v2087_v50 }
 0x831   :  { %v1310_v25 = vmul.f32 %v1897_v51, %v2295_v20 }
 0x832   :  { %1904 = vrcp.f32 %v1288_v23  ;;  %v1295_v30 = vrot.slane %v1281_v18, %v2087_v50  ;;  %v1296_v44 = vcombine.high %v1288_v23, %v1288_v23 }
 0x833   :  { %1906 = vrcp.f32 %v1247_v2  ;;  %1335 = vperm.xlu0 %1833, %v1310_v25  }
 0x834   :  { %v1899_v29 = vpop.eup %1898  ;;  %1908 = vrcp.f32 %v1264_v17 }
 0x835   :  { %v1316_v32 = vmul.f32 %v1899_v29, %v2291_v9  ;;  %1910 = vrcp.f32 %v1263_v26 }
 0x836   :  { %1912 = vrcp.f32 %v1295_v30 }
 0x837   :  { %1371 = vperm.xlu0 %1833, %v1316_v32   ;;  %1914 = vrcp.f32 %v1280_v37 }
 0x838   :  { %v1901_v33 = vpop.eup %1900  ;;  %1916 = vrcp.f32 %v1279_v40 }
 0x839   :  { %v1322_v38 = vmul.f32 %v1901_v33, %v2312_v21  ;;  %v1903_v20 = vpop.eup %1902  ;;  %1918 = vrcp.f32 %v1296_v44 }
 0x83a   :  { %v1312_v11 = vmul.f32 %v1903_v20, %v2297_v52 }
 0x83b   :  { %1407 = vperm.xlu0 %1833, %v1322_v38  }
 0x83c   :  { %v1905_v39 = vpop.eup %1904 }
 0x83d   :  { %v1907_v41 = vpop.eup %1906  ;;  %v1328_v42 = vmul.f32 %v1905_v39, %v2314_v22 }
 0x83e   :  { %v1909_v9 = vpop.eup %1908  ;;  %v1314_v3 = vmul.f32 %v1907_v41, %v2299_v19 }
 0x83f   :  { %1347 = vperm.xlu0 %1833, %v1312_v11   ;;  %1443 = vperm.xlu1 %1832, %v1328_v42   ;;  %v1911_v43 = vpop.eup %1910  ;;  %v1318_v21 = vmul.f32 %v1909_v9, %v2293_v10 }
 0x840   :  { %v1913_v45 = vpop.eup %1912  ;;  %v1320_v8 = vmul.f32 %v1911_v43, %v2305_v14 }
 0x841   :  { %v1332_v52 = vmul.f32 %v1913_v45, %v2321_v28  ;;  %v1915_v36 = vpop.eup %1914 }
 0x842   :  { %v1324_v22 = vmul.f32 %v1915_v36, %v2307_v16  ;;  %v1917_v48 = vpop.eup %1916 }
 0x843   :  { %1359 = vperm.xlu0 %1833, %v1314_v3   ;;  %1383 = vperm.xlu1 %1832, %v1318_v21   ;;  %v1326_v5 = vmul.f32 %v1917_v48, %v2327_v31  ;;  %v1919_v19 = vpop.eup %1918 }
 0x844   :  { %v1330_v10 = vmul.f32 %v1919_v19, %v2319_v27 }
 0x847   :  { %1395 = vperm.xlu0 %1833, %v1320_v8   ;;  %1467 = vperm.xlu1 %1832, %v1332_v52  }
 0x84b   :  { %1419 = vperm.xlu0 %1833, %v1324_v22  }
 0x84f   :  { %1431 = vperm.xlu0 %1833, %v1326_v5  }
 0x853   :  { %1455 = vperm.xlu0 %1833, %v1330_v10  }
 0x8b2   :  { %v1336_v6 = vpop.permute.xlu0 %1335 }
 0x8b3   :  { %v1344_v58 = vrot.slane %v1336_v6, %v2251_v60 }
 0x8b6   :  { %v1372_v54 = vpop.permute.xlu0 %1371 }
 0x8b7   :  { %v1380_v16 = vrot.slane %v1372_v54, %v2251_v60 }
 0x8ba   :  { %v1408_v55 = vpop.permute.xlu0 %1407 }
 0x8bb   :  { %v1416_v4 = vrot.slane %v1408_v55, %v2251_v60 }
 0x8be   :  { %v1348_v14 = vpop.permute.xlu0 %1347  ;;  %v1444_v56 = vpop.permute.xlu1 %1443 }
 0x8bf   :  { %v1356_v28 = vrot.slane %v1348_v14, %v2251_v60  ;;  %v1452_v32 = vrot.slane %v1444_v56, %v2251_v60 }
 0x8c1   :  { %v1489_v34 = vcombine.low %v1344_v58, %v1356_v28 }
 0x8c2   :  { %v1360_v59 = vpop.permute.xlu0 %1359  ;;  %v1384_v62 = vpop.permute.xlu1 %1383 }
 0x8c3   :  { %v1368_v31 = vrot.slane %v1360_v59, %v2251_v60  ;;  %v1497_v27 = vrot.slane %v1489_v34, %v2087_v50  ;;  %v1392_v57 = vrot.slane %v1384_v62, %v2251_v60 }
 0x8c5   :  { %v1490_v12 = vcombine.low %v1368_v31, %v1380_v16 }
 0x8c6   :  { %v1396_v63 = vpop.permute.xlu0 %1395  ;;  %v1468_v26 = vpop.permute.xlu1 %1467 }
 0x8c7   :  { %v1504_v61 = vrot.slane %v1490_v12, %v2087_v50  ;;  %v1404_v0 = vrot.slane %v1396_v63, %v2251_v60  ;;  %v1476_v35 = vrot.slane %v1468_v26, %v2251_v60 }
 0x8c9   :  { %v1505_v7 = vcombine.low %v1497_v27, %v1504_v61  ;;  %v1506_v1 = vcombine.low %v1392_v57, %v1404_v0 }
 0x8ca   :  { %v1420_v15 = vpop.permute.xlu0 %1419 }
 0x8cb   :  { %v1543_v24 = vmul.f32 %v2164_v46, %v1505_v7  ;;  %v1428_v2 = vrot.slane %v1420_v15, %v2251_v60  ;;  %v1514_v17 = vrot.slane %v1506_v1, %v2087_v50 }
 0x8cd   :  { %v1549_v13 = vcombine.high %v1543_v24, %v1543_v24  ;;  %v1556_v49 = vrot.slane %v1543_v24, %v2087_v50  ;;  %v1507_v51 = vcombine.low %v1416_v4, %v1428_v2 }
 0x8ce   :  { %v1432_v18 = vpop.permute.xlu0 %1431 }
 0x8cf   :  { %v1563_v23 = vrot.slane %v1549_v13, %v2087_v50  ;;  %v1564_v25 = vcombine.high %v1556_v49, %v1556_v49  ;;  %v1521_v29 = vrot.slane %v1507_v51, %v2087_v50  ;;  %v1440_v30 = vrot.slane %v1432_v18, %v2251_v60 }
 0x8d1   :  { %v1600_v46 = vcombine.low %v1556_v49, %v1564_v25  ;;  %v1522_v33 = vcombine.low %v1514_v17, %v1521_v29  ;;  %v1523_v37 = vcombine.low %v1440_v30, %v1452_v32  ;;  %v1614_v39 = vrot.slane %v1563_v23, %v2087_v50 }
 0x8d2   :  { %v1456_v38 = vpop.permute.xlu0 %1455  ;;  %v1565_v11 = vcombine.high %v1563_v23, %v1563_v23 }
 0x8d3   :  { %v1607_v20 = vrot.slane %v1600_v46, %v2087_v50  ;;  %v1544_v40 = vmul.f32 %v2169_v53, %v1522_v33  ;;  %v1464_v41 = vrot.slane %v1456_v38, %v2251_v60  ;;  %v1531_v3 = vrot.slane %v1523_v37, %v2087_v50 }
 0x8d5   :  { %v1615_v42 = vcombine.low %v1607_v20, %v1614_v39  ;;  %v1566_v9 = vcombine.high %v1544_v40, %v1544_v40  ;;  %v1573_v44 = vrot.slane %v1544_v40, %v2087_v50  ;;  %v1524_v43 = vcombine.low %v1464_v41, %v1476_v35 }
 0x8d7   :  { %v1580_v21 = vrot.slane %v1566_v9, %v2087_v50  ;;  %v1581_v45 = vcombine.high %v1573_v44, %v1573_v44  ;;  %v1616_v8 = vcombine.low %v1565_v11, %v1573_v44  ;;  %v1538_v52 = vrot.slane %v1524_v43, %v2087_v50 }
 0x8d8   :  { %v1668_v36 = vsel %vm406_vm7, %v1615_v42, 0.0 }
 0x8d9   :  { %v1582_v22 = vcombine.high %v1580_v21, %v1580_v21  ;;  %v1623_v53 = vrot.slane %v1616_v8, %v2087_v50  ;;  %v1630_v60 = vrot.slane %v1581_v45, %v2087_v50  ;;  %v1539_v48 = vcombine.low %v1531_v3, %v1538_v52 }
 0x8da   :  { %v1669_v6 = vrot.slane %v1668_v36, 4 }
 0x8db   :  { %v1631_v5 = vcombine.low %v1623_v53, %v1630_v60  ;;  %v1632_v19 = vcombine.low %v1580_v21, %v1582_v22  ;;  %v1545_v10 = vmul.f32 %v2166_v47, %v1539_v48 }
 0x8dc   :  { %v1670_v34 = vadd.f32 %v1669_v6, %v1668_v36 }
 0x8dd   :  { %v1583_v54 = vcombine.high %v1545_v10, %v1545_v10  ;;  %v1590_v55 = vrot.slane %v1545_v10, %v2087_v50  ;;  %v1675_v14 = vsel %vm406_vm7, %v1631_v5, 0.0  ;;  %v1639_v28 = vrot.slane %v1632_v19, %v2087_v50 }
 0x8de   :  { %v1676_v56 = vrot.slane %v1675_v14, 4  ;;  %v1671_v57 = vrot.slane %v1670_v34, 2 }
 0x8df   :  { %v1597_v58 = vrot.slane %v1583_v54, %v2087_v50  ;;  %v1598_v59 = vcombine.high %v1590_v55, %v1590_v55  ;;  %v1646_v16 = vrot.slane %v1590_v55, %v2087_v50 }
 0x8e0   :  { %v1677_v31 = vadd.f32 %v1676_v56, %v1675_v14  ;;  %v1672_v2 = vadd.f32 %v1671_v57, %v1670_v34 }
 0x8e1   :  { %v1599_v62 = vcombine.high %v1597_v58, %v1597_v58  ;;  %v1647_v12 = vcombine.low %v1639_v28, %v1646_v16  ;;  %v1648_v63 = vcombine.low %v1598_v59, %v1597_v58 }
 0x8e2   :  { %v1678_v47 = vrot.slane %v1677_v31, 2  ;;  %v1673_v23 = vrot.slane %v1672_v2, 1 }
 0x8e3   :  { %v1655_v27 = vrot.slane %v1648_v63, %v2087_v50  ;;  %v1662_v61 = vrot.slane %v1599_v62, %v2087_v50  ;;  %v1682_v0 = vsel %vm406_vm7, %v1647_v12, 0.0 }
 0x8e4   :  { %v1683_v7 = vrot.slane %v1682_v0, 4  ;;  %v1679_v15 = vadd.f32 %v1678_v47, %v1677_v31  ;;  %v1674_v32 = vadd.f32 %v1673_v23, %v1672_v2 }
 0x8e5   :  { %v1663_v1 = vcombine.low %v1655_v27, %v1662_v61 }
 0x8e6   :  { %v1684_v4 = vadd.f32 %v1683_v7, %v1682_v0  ;;  %v1680_v51 = vrot.slane %v1679_v15, 1 }
 0x8e7   :  { %v1689_v24 = vsel %vm406_vm7, %v1663_v1, 0.0 }
 0x8e8   :  { %v1685_v13 = vrot.slane %v1684_v4, 2  ;;  %v1690_v49 = vrot.slane %v1689_v24, 4  ;;  %v1681_v29 = vadd.f32 %v1680_v51, %v1679_v15 }
 0x8ea   :  { %v1686_v17 = vadd.f32 %v1685_v13, %v1684_v4  ;;  %v1691_v18 = vadd.f32 %v1690_v49, %v1689_v24  ;;  %v1700_v35 = vsel %vm456_vm8, %v1681_v29, %v1674_v32 }
 0x8ec   :  { %v1687_v25 = vrot.slane %v1686_v17, 1  ;;  %v1692_v26 = vrot.slane %v1691_v18, 2 }
 0x8ee   :  { %v1693_v50 = vadd.f32 %v1692_v26, %v1691_v18  ;;  %v1688_v30 = vadd.f32 %v1687_v25, %v1686_v17 }
 0x8f0   :  { %v1694_v46 = vrot.slane %v1693_v50, 1  ;;  %v1701_v37 = vsel %vm458_vm9, %v1688_v30, %v1700_v35 }
 0x8f2   :  { %v1695_v33 = vadd.f32 %v1694_v46, %v1693_v50 }
 0x8f4   :  { %v1702_v38 = vsel %vm460_vm10, %v1695_v33, %v1701_v37 }
 0x8f5   :  { %1705 = vst.msk [vmem:[#allocation3] sm:$0xf] %vm1704_vm13, %v1702_v38 }
 0x8f6   :  { %1931 = shalt.err (!%p1928_p4)
}
 0x8f7   :  { %s1932_s4 = scalar_lea.hbm %s2442_s14, 64 }
 0x8f8   :  { %p1933_p5 = scmp.ne.s32.totalorder %s2442_s14, %s1932_s4  ;;  %p1936_p6 = scmp.lt.u32.totalorder %s1932_s4, %s2442_s14 }
 0x8fa   :  { %p1938_p7 = pnand %p1936_p6, %p1933_p5 }
 0x8fc   :  { %1941 = shalt.err (!%p1938_p7)
}
 0x8fd   :  { %1715 = dma.vmem_to_hbm [thread:$0]  %s1713_s12, 64, %s2442_s14, [#allocation4]  }
 0x8fe   :  { %1942 = dma.done.wait [#allocation4], 64  }
 0x8ff   :  { %1943 = vsyncadd [#allocation4], 4294967232 }
 0x900   :  { %1719 = vsyncpa [#allocation4], 1 }

</bundles_post_ra>
